<compile_context>
chip_gen: v6e
topology: v6e:2x2x1
jax: 0.10.0
libtpu: 0.0.40
codegen_flags: <defaults>
</compile_context>

<pallas_src>
import functools

import jax
import jax.numpy as jnp
from jax.experimental import pallas as pl
from jax.experimental.pallas import tpu as pltpu


def _round_up(x, m):
    return ((x + m - 1) // m) * m


def _cdiv(a, b):
    return -(-a // b)


# --------------------------------------------------------------------------
# Fused kernel.
# Grid = (P, G): P row-partitions ("parallel" -> sharded across TensorCores
# on v7x), G row-tiles per partition ("arbitrary" reduction axis).
# --------------------------------------------------------------------------
def _criterion_kernel(pred_ref, tgt_ref, mask_ref,
                      end_logits_ref, end_tgt_ref, att_ref,
                      seq_out_ref, sen_out_ref, att_out_ref,
                      acc_ref, *, m_valid):
    p = pl.program_id(0)
    k = pl.program_id(1)

    # ---- per-partition init + tiny side losses (computed once per partition,
    #      kept only on partition 0 to avoid double counting) ----
    @pl.when(k == 0)
    def _():
        acc_ref[...] = jnp.zeros_like(acc_ref)

        # CrossEntropyLoss(size_average=False) == sum(logsumexp - logits[tgt])
        logits = end_logits_ref[...].astype(jnp.float32)           # (Mp, 2)
        tgt_end = end_tgt_ref[...]                                 # (Mp, 1) i32
        m = jnp.max(logits, axis=-1, keepdims=True)
        lse = m + jnp.log(jnp.sum(jnp.exp(logits - m), axis=-1, keepdims=True))
        col2 = jax.lax.broadcasted_iota(jnp.int32, logits.shape, 1)
        picked = jnp.sum(jnp.where(col2 == tgt_end, logits, 0.0),
                         axis=-1, keepdims=True)
        row = jax.lax.broadcasted_iota(jnp.int32, lse.shape, 0)
        valid = (row < m_valid).astype(jnp.float32)                # mask padded rows
        sen = jnp.sum((lse - picked) * valid)
        att = jnp.sum(att_ref[...].astype(jnp.float32))

        keep = (p == 0)
        sen_out_ref[0, 0] = jnp.where(keep, sen, 0.0)
        att_out_ref[0, 0] = jnp.where(keep, att, 0.0)

    # ---- masked NLL over this (row_tile, V) block of log-probs ----
    pred = pred_ref[...].astype(jnp.float32)                       # (RT, V)
    tgt = tgt_ref[...]                                             # (RT, 1) i32
    mask = mask_ref[...].astype(jnp.float32)                       # (RT, 1) in {0, 1}

    # target_seq + 2*(mask == 0) - 2   (same adjustment as the PyTorch code)
    add = jnp.where(mask == 0.0, 2, 0).astype(jnp.int32)
    adj = tgt + add - 2                                            # adjusted vocab index
    col = jax.lax.broadcasted_iota(jnp.int32, pred.shape, 1)
    gathered = jnp.sum(jnp.where(col == adj, pred, 0.0), axis=-1, keepdims=True)
    acc_ref[...] += -gathered * mask                               # (RT, 1) partial sums

    # ---- finalize: one cross-sublane reduce + one scalar store per partition ----
    @pl.when(k == pl.num_programs(1) - 1)
    def _():
        seq_out_ref[0, 0] = jnp.sum(acc_ref[...])


# --------------------------------------------------------------------------
# Wrapper (glue: slicing / reshapes / padding, final scalar weighting)
# --------------------------------------------------------------------------
def criterion_forward(pred_seq, pred_end, target_seq, target_end, mask,
                      all_att_cost, *, weight_sen, weight_word, aat_lambda,
                      row_tile=None, vmem_budget_bytes=20 * 1024 * 1024):
    # TODO(synk): `loader` argument of the PyTorch forward is unused -> omitted.
    # TODO(synk): if the upstream log_softmax producing pred_seq can be fused
    #             here (read raw logits once, do row-wise logsumexp in-tile),
    #             total HBM traffic for the loss path roughly halves.
    B, S, T, V = pred_seq.shape
    L = pred_end.shape[1]

    # ---- glue: mirrors the PyTorch slicing / view logic ----
    target_end_f = target_end[:, :L].reshape(-1, 1).astype(jnp.int32)      # (M, 1)
    pred_end_f = pred_end.reshape(-1, 2).astype(jnp.float32)               # (M, 2)
    pred_flat = pred_seq.reshape(-1, V)                                    # (N, V), keep dtype (f32 or bf16)
    tgt_flat = target_seq[:, :, :T].reshape(-1, 1).astype(jnp.int32)       # (N, 1)
    mask_flat = mask[:, :, :T].reshape(-1, 1).astype(jnp.float32)          # (N, 1)
    att_vec = jnp.stack(all_att_cost).reshape(1, -1).astype(jnp.float32)   # (1, K)

    N = pred_flat.shape[0]
    M = pred_end_f.shape[0]
    K = att_vec.shape[1]

    # ---- row-tile selection: largest tile whose double-buffered (rt, V)
    # log-prob block fits the VMEM budget (conservative for v7x's 64 MiB
    # physical / v5e's 16 MiB scoped-default; we raise the scoped limit to
    # 32 MiB below, valid on every generation). ----
    bytes_per_row = _round_up(V, 128) * pred_flat.dtype.itemsize
    if row_tile is None:
        rt = int(vmem_budget_bytes // (2 * bytes_per_row))
        rt = min(1024, rt)
    else:
        rt = int(row_tile)
    rt = max(8, (rt // 8) * 8)
    rt = min(rt, _round_up(N, 8))          # don't over-pad tiny inputs
    rt = max(rt, 8)

    n_tiles = _cdiv(N, rt)
    P = 2 if n_tiles >= 2 else 1           # use both TensorCores on v7x (neutral on 1-TC chips)
    G = _cdiv(n_tiles, P)
    N_pad = P * G * rt

    if N_pad != N:                         # pad with mask == 0 rows -> contribute exactly 0
        pad = N_pad - N
        pred_flat = jnp.pad(pred_flat, ((0, pad), (0, 0)))
        tgt_flat = jnp.pad(tgt_flat, ((0, pad), (0, 0)))
        mask_flat = jnp.pad(mask_flat, ((0, pad), (0, 0)))

    M_pad = _round_up(M, 8)                # sublane-align the tiny end-of-sentence head
    if M_pad != M:
        pred_end_f = jnp.pad(pred_end_f, ((0, M_pad - M), (0, 0)))
        target_end_f = jnp.pad(target_end_f, ((0, M_pad - M), (0, 0)))

    kernel = functools.partial(_criterion_kernel, m_valid=M)
    row_map = lambda p, k: (p * G + k, 0)
    const_map = lambda p, k: (0, 0)

    seq_p, sen_p, att_p = pl.pallas_call(
        kernel,
        out_shape=(jax.ShapeDtypeStruct((P, 1), jnp.float32),
                   jax.ShapeDtypeStruct((P, 1), jnp.float32),
                   jax.ShapeDtypeStruct((P, 1), jnp.float32)),
        grid=(P, G),
        in_specs=[
            pl.BlockSpec((rt, V), row_map),          # streamed log-probs (HBM-bound)
            pl.BlockSpec((rt, 1), row_map),          # raw targets (word idx + 2)
            pl.BlockSpec((rt, 1), row_map),          # {0,1} mask
            pl.BlockSpec((M_pad, 2), const_map),     # end-of-sentence logits (resident)
            pl.BlockSpec((M_pad, 1), const_map),     # end-of-sentence targets (resident)
            pl.BlockSpec((1, K), const_map),         # stacked attention costs (resident)
        ],
        out_specs=(
            pl.BlockSpec((1, 1), lambda p, k: (p, 0), memory_space=pltpu.SMEM),
            pl.BlockSpec((1, 1), lambda p, k: (p, 0), memory_space=pltpu.SMEM),
            pl.BlockSpec((1, 1), lambda p, k: (p, 0), memory_space=pltpu.SMEM),
        ),
        scratch_shapes=[pltpu.VMEM((rt, 1), jnp.float32)],
        compiler_params=pltpu.CompilerParams(
            dimension_semantics=("parallel", "arbitrary"),
            vmem_limit_bytes=32 * 1024 * 1024,
        ),
    )(pred_flat, tgt_flat, mask_flat, pred_end_f, target_end_f, att_vec)

    loss_seq = jnp.sum(seq_p) / B
    loss_sen = jnp.sum(sen_p) / B
    loss_att = jnp.sum(att_p) / B
    loss_all = (loss_seq * weight_word + loss_sen * weight_sen
                + aat_lambda * loss_att)
    return loss_seq, loss_sen, loss_att, loss_all


# --------------------------------------------------------------------------
# Pure-JAX reference (for correctness check only)
# --------------------------------------------------------------------------
def criterion_reference(pred_seq, pred_end, target_seq, target_end, mask,
                        all_att_cost, *, weight_sen, weight_word, aat_lambda):
    B, S, T, V = pred_seq.shape
    L = pred_end.shape[1]
    te = target_end[:, :L].reshape(-1)
    pe = pred_end.reshape(-1, 2).astype(jnp.float32)
    ts_adj = target_seq[:, :, :T] + jnp.where(mask[:, :, :T] == 0, 2, 0) - 2
    pred_flat = pred_seq.reshape(-1, V).astype(jnp.float32)
    ts_flat = ts_adj.reshape(-1)
    m_flat = mask[:, :, :T].reshape(-1).astype(jnp.float32)
    gathered = jnp.take_along_axis(pred_flat, ts_flat[:, None], axis=1)[:, 0]
    loss_seq = jnp.sum(-gathered * m_flat) / B
    lse = jax.scipy.special.logsumexp(pe, axis=-1)
    picked = jnp.take_along_axis(pe, te[:, None], axis=1)[:, 0]
    loss_sen = jnp.sum(lse - picked) / B
    loss_att = jnp.sum(jnp.stack(all_att_cost)) / B
    loss_all = (loss_seq * weight_word + loss_sen * weight_sen
                + aat_lambda * loss_att)
    return loss_seq, loss_sen, loss_att, loss_all


if __name__ == "__main__":
    key = jax.random.PRNGKey(0)
    B, S, T, V, L = 2, 3, 8, 128, 8
    k1, k2, k3, k4, k5, k6 = jax.random.split(key, 6)

    # Deterministic synthetic inputs consistent with the forward:
    pred_seq = jax.nn.log_softmax(
        jax.random.normal(k1, (B, S, T, V), jnp.float32), axis=-1)    # log-probs
    pred_end = jax.random.normal(k2, (B, L, 2), jnp.float32)          # 2-way logits
    mask = (jax.random.uniform(k3, (B, S, T)) > 0.3).astype(jnp.float32)
    words = jax.random.randint(k4, (B, S, T), 2, V + 2)               # word idx offset by +2
    target_seq = jnp.where(mask > 0, words, 0).astype(jnp.int32)
    target_end = jax.random.randint(k5, (B, L + 2), 0, 2).astype(jnp.int32)
    all_att_cost = [0.5 * jax.random.uniform(k, (), jnp.float32)
                    for k in jax.random.split(k6, 3)]

    # Hyper-parameters from opt (deterministic, no checkpoint):
    weight_sen, weight_word, aat_lambda = 1.0, 1.0, 0.2

    ref = criterion_reference(pred_seq, pred_end, target_seq, target_end, mask,
                              all_att_cost, weight_sen=weight_sen,
                              weight_word=weight_word, aat_lambda=aat_lambda)

    # 1) default (auto-sized) row tile
    out = criterion_forward(pred_seq, pred_end, target_seq, target_end, mask,
                            all_att_cost, weight_sen=weight_sen,
                            weight_word=weight_word, aat_lambda=aat_lambda)
    out = jax.block_until_ready(out)

    # 2) forced small tile -> exercises row padding + the 2-partition parallel grid
    out_small = criterion_forward(pred_seq, pred_end, target_seq, target_end,
                                  mask, all_att_cost, weight_sen=weight_sen,
                                  weight_word=weight_word,
                                  aat_lambda=aat_lambda, row_tile=16)
    out_small = jax.block_until_ready(out_small)

    names = ("loss_seq", "loss_sen", "loss_att", "loss_all")
    for name, a, b in zip(names, out, ref):
        assert jnp.allclose(a, b, atol=1e-4, rtol=1e-4), (name, float(a), float(b))
    for name, a, b in zip(names, out_small, ref):
        assert jnp.allclose(a, b, atol=1e-4, rtol=1e-4), (name, float(a), float(b))

    print("KERNEL_OK")
</pallas_src>

<mosaic_0001>
module attributes {stable_mosaic.version = 11 : i64} {
  func.func @_criterion_kernel(%arg0: i32, %arg1: i32, %arg2: memref<48x128xf32, #tpu.memory_space<vmem>>, %arg3: memref<48x1xi32, #tpu.memory_space<vmem>>, %arg4: memref<48x1xf32, #tpu.memory_space<vmem>>, %arg5: memref<16x2xf32, #tpu.memory_space<vmem>>, %arg6: memref<16x1xi32, #tpu.memory_space<vmem>>, %arg7: memref<1x3xf32, #tpu.memory_space<vmem>>, %arg8: memref<1x1xf32, #tpu.memory_space<smem>>, %arg9: memref<1x1xf32, #tpu.memory_space<smem>>, %arg10: memref<1x1xf32, #tpu.memory_space<smem>>, %arg11: memref<48x1xf32, #tpu.memory_space<vmem>>) attributes {dimension_semantics = [#tpu.dimension_semantics<parallel>, #tpu.dimension_semantics<arbitrary>], iteration_bounds = array<i64: 1, 1>, scalar_prefetch = 0 : i64, scratch_operands = 1 : i64, tpu.core_type = #tpu.core_type<tc>, window_params = [{transform_indices = @transform_0, window_bounds = array<i64: 48, 128>}, {transform_indices = @transform_1, window_bounds = array<i64: 48, 1>}, {transform_indices = @transform_2, window_bounds = array<i64: 48, 1>}, {pipeline_mode = #tpu.pipeline_mode<synchronous>, transform_indices = @transform_3, window_bounds = array<i64: 16, 2>}, {pipeline_mode = #tpu.pipeline_mode<synchronous>, transform_indices = @transform_4, window_bounds = array<i64: 16, 1>}, {pipeline_mode = #tpu.pipeline_mode<synchronous>, transform_indices = @transform_5, window_bounds = array<i64: 1, 3>}, {transform_indices = @transform_6, window_bounds = array<i64: 1, 1>}, {transform_indices = @transform_7, window_bounds = array<i64: 1, 1>}, {transform_indices = @transform_8, window_bounds = array<i64: 1, 1>}]} {
    %c0_i32 = arith.constant 0 : i32
    %0 = arith.cmpi eq, %arg1, %c0_i32 : i32
    %1 = arith.extui %0 : i1 to i32
    %c0_i32_0 = arith.constant 0 : i32
    %2 = arith.cmpi ne, %1, %c0_i32_0 : i32
    scf.if %2 {
      %cst_17 = arith.constant 0.000000e+00 : f32
      %30 = vector.broadcast %cst_17 : f32 to vector<48x1xf32>
      %c0_18 = arith.constant 0 : index
      %c0_19 = arith.constant 0 : index
      %31 = vector.load %arg11[%c0_18, %c0_19] : memref<48x1xf32, #tpu.memory_space<vmem>>, vector<48x1xf32>
      tpu.vector_store %arg11[%c0_18, %c0_19], %30 {strides = array<i32>} : memref<48x1xf32, #tpu.memory_space<vmem>>, vector<48x1xf32>,
      %c0_20 = arith.constant 0 : index
      %c0_21 = arith.constant 0 : index
      %32 = vector.load %arg5[%c0_20, %c0_21] : memref<16x2xf32, #tpu.memory_space<vmem>>, vector<16x2xf32>
      %c0_22 = arith.constant 0 : index
      %c0_23 = arith.constant 0 : index
      %33 = vector.load %arg6[%c0_22, %c0_23] : memref<16x1xi32, #tpu.memory_space<vmem>>, vector<16x1xi32>
      %cst_24 = arith.constant dense<0xFF800000> : vector<16xf32>
      %34 = vector.multi_reduction <maximumf>, %32, %cst_24 [1] : vector<16x2xf32> to vector<16xf32>
      %35 = vector.shape_cast %34 : vector<16xf32> to vector<16x1xf32>
      %36 = vector.broadcast %35 : vector<16x1xf32> to vector<16x2xf32>
      %37 = arith.subf %32, %36 : vector<16x2xf32>
      %38 = math.exp %37 : vector<16x2xf32>
      %cst_25 = arith.constant dense<0.000000e+00> : vector<16xf32>
      %39 = vector.multi_reduction <add>, %38, %cst_25 [1] : vector<16x2xf32> to vector<16xf32>
      %40 = vector.shape_cast %39 : vector<16xf32> to vector<16x1xf32>
      %41 = math.log %40 : vector<16x1xf32>
      %42 = arith.addf %35, %41 : vector<16x1xf32>
      %43 = tpu.iota {dimensions = array<i32: 1>} : vector<16x2xi32>
      %44 = vector.broadcast %33 : vector<16x1xi32> to vector<16x2xi32>
      %45 = arith.cmpi eq, %43, %44 : vector<16x2xi32>
      %cst_26 = arith.constant 0.000000e+00 : f32
      %46 = vector.broadcast %cst_26 : f32 to vector<16x2xf32>
      %47 = arith.select %45, %32, %46 : vector<16x2xi1>, vector<16x2xf32>
      %cst_27 = arith.constant dense<0.000000e+00> : vector<16xf32>
      %48 = vector.multi_reduction <add>, %47, %cst_27 [1] : vector<16x2xf32> to vector<16xf32>
      %49 = vector.shape_cast %48 : vector<16xf32> to vector<16x1xf32>
      %50 = tpu.iota {dimensions = array<i32: 0>} : vector<16x1xi32>
      %c16_i32 = arith.constant 16 : i32
      %51 = vector.broadcast %c16_i32 : i32 to vector<16x1xi32>
      %52 = arith.cmpi slt, %50, %51 : vector<16x1xi32>
      %53 = arith.extui %52 : vector<16x1xi1> to vector<16x1xi32>
      %54 = arith.sitofp %53 : vector<16x1xi32> to vector<16x1xf32>
      %55 = arith.subf %42, %49 : vector<16x1xf32>
      %56 = arith.mulf %55, %54 : vector<16x1xf32>
      %57 = vector.shape_cast %56 : vector<16x1xf32> to vector<1x16x1xf32>
      %cst_28 = arith.constant dense<0.000000e+00> : vector<1xf32>
      %58 = vector.multi_reduction <add>, %57, %cst_28 [1, 2] : vector<1x16x1xf32> to vector<1xf32>
      %59 = vector.shape_cast %58 : vector<1xf32> to vector<1x1x1xf32>
      %60 = vector.extract %59[0, 0, 0] : f32 from vector<1x1x1xf32>
      %c0_29 = arith.constant 0 : index
      %c0_30 = arith.constant 0 : index
      %61 = vector.load %arg7[%c0_29, %c0_30] : memref<1x3xf32, #tpu.memory_space<vmem>>, vector<1x3xf32>
      %62 = vector.shape_cast %61 : vector<1x3xf32> to vector<1x1x3xf32>
      %cst_31 = arith.constant dense<0.000000e+00> : vector<1xf32>
      %63 = vector.multi_reduction <add>, %62, %cst_31 [1, 2] : vector<1x1x3xf32> to vector<1xf32>
      %64 = vector.shape_cast %63 : vector<1xf32> to vector<1x1x1xf32>
      %65 = vector.extract %64[0, 0, 0] : f32 from vector<1x1x1xf32>
      %c0_i32_32 = arith.constant 0 : i32
      %66 = arith.cmpi eq, %arg0, %c0_i32_32 : i32
      %cst_33 = arith.constant 0.000000e+00 : f32
      %67 = arith.select %66, %60, %cst_33 : f32
      %c0_34 = arith.constant 0 : index
      %c0_35 = arith.constant 0 : index
      %68 = memref.load %arg9[%c0_34, %c0_35] : memref<1x1xf32, #tpu.memory_space<smem>>
      memref.store %67, %arg9[%c0_34, %c0_35] : memref<1x1xf32, #tpu.memory_space<smem>>
      %cst_36 = arith.constant 0.000000e+00 : f32
      %69 = arith.select %66, %65, %cst_36 : f32
      %c0_37 = arith.constant 0 : index
      %c0_38 = arith.constant 0 : index
      %70 = memref.load %arg10[%c0_37, %c0_38] : memref<1x1xf32, #tpu.memory_space<smem>>
      memref.store %69, %arg10[%c0_37, %c0_38] : memref<1x1xf32, #tpu.memory_space<smem>>
    } else {
    }
    %c0 = arith.constant 0 : index
    %c0_1 = arith.constant 0 : index
    %3 = vector.load %arg2[%c0, %c0_1] : memref<48x128xf32, #tpu.memory_space<vmem>>, vector<48x128xf32>
    %c0_2 = arith.constant 0 : index
    %c0_3 = arith.constant 0 : index
    %4 = vector.load %arg3[%c0_2, %c0_3] : memref<48x1xi32, #tpu.memory_space<vmem>>, vector<48x1xi32>
    %c0_4 = arith.constant 0 : index
    %c0_5 = arith.constant 0 : index
    %5 = vector.load %arg4[%c0_4, %c0_5] : memref<48x1xf32, #tpu.memory_space<vmem>>, vector<48x1xf32>
    %cst = arith.constant 0.000000e+00 : f32
    %6 = vector.broadcast %cst : f32 to vector<48x1xf32>
    %7 = arith.cmpf oeq, %5, %6 : vector<48x1xf32>
    %c2_i32 = arith.constant 2 : i32
    %c0_i32_6 = arith.constant 0 : i32
    %8 = vector.broadcast %c2_i32 : i32 to vector<48x1xi32>
    %9 = vector.broadcast %c0_i32_6 : i32 to vector<48x1xi32>
    %10 = arith.select %7, %8, %9 : vector<48x1xi1>, vector<48x1xi32>
    %11 = arith.addi %4, %10 : vector<48x1xi32>
    %c2_i32_7 = arith.constant 2 : i32
    %12 = vector.broadcast %c2_i32_7 : i32 to vector<48x1xi32>
    %13 = arith.subi %11, %12 : vector<48x1xi32>
    %14 = tpu.iota {dimensions = array<i32: 1>} : vector<48x128xi32>
    %15 = vector.broadcast %13 : vector<48x1xi32> to vector<48x128xi32>
    %16 = arith.cmpi eq, %14, %15 : vector<48x128xi32>
    %cst_8 = arith.constant 0.000000e+00 : f32
    %17 = vector.broadcast %cst_8 : f32 to vector<48x128xf32>
    %18 = arith.select %16, %3, %17 : vector<48x128xi1>, vector<48x128xf32>
    %cst_9 = arith.constant dense<0.000000e+00> : vector<48xf32>
    %19 = vector.multi_reduction <add>, %18, %cst_9 [1] : vector<48x128xf32> to vector<48xf32>
    %20 = vector.shape_cast %19 : vector<48xf32> to vector<48x1xf32>
    %c0_10 = arith.constant 0 : index
    %c0_11 = arith.constant 0 : index
    %21 = vector.load %arg11[%c0_10, %c0_11] : memref<48x1xf32, #tpu.memory_space<vmem>>, vector<48x1xf32>
    %cst_12 = arith.constant 0.000000e+00 : f32
    %22 = vector.broadcast %cst_12 : f32 to vector<48x1xf32>
    %23 = arith.subf %22, %20 : vector<48x1xf32>
    %24 = arith.mulf %23, %5 : vector<48x1xf32>
    %25 = arith.addf %21, %24 : vector<48x1xf32>
    %c0_13 = arith.constant 0 : index
    %c0_14 = arith.constant 0 : index
    %26 = vector.load %arg11[%c0_13, %c0_14] : memref<48x1xf32, #tpu.memory_space<vmem>>, vector<48x1xf32>
    tpu.vector_store %arg11[%c0_13, %c0_14], %25 {strides = array<i32>} : memref<48x1xf32, #tpu.memory_space<vmem>>, vector<48x1xf32>,
    %c0_i32_15 = arith.constant 0 : i32
    %27 = arith.cmpi eq, %arg1, %c0_i32_15 : i32
    %28 = arith.extui %27 : i1 to i32
    %c0_i32_16 = arith.constant 0 : i32
    %29 = arith.cmpi ne, %28, %c0_i32_16 : i32
    scf.if %29 {
      %c0_17 = arith.constant 0 : index
      %c0_18 = arith.constant 0 : index
      %30 = vector.load %arg11[%c0_17, %c0_18] : memref<48x1xf32, #tpu.memory_space<vmem>>, vector<48x1xf32>
      %31 = vector.shape_cast %30 : vector<48x1xf32> to vector<1x48x1xf32>
      %cst_19 = arith.constant dense<0.000000e+00> : vector<1xf32>
      %32 = vector.multi_reduction <add>, %31, %cst_19 [1, 2] : vector<1x48x1xf32> to vector<1xf32>
      %33 = vector.shape_cast %32 : vector<1xf32> to vector<1x1x1xf32>
      %34 = vector.extract %33[0, 0, 0] : f32 from vector<1x1x1xf32>
      %c0_20 = arith.constant 0 : index
      %c0_21 = arith.constant 0 : index
      %35 = memref.load %arg8[%c0_20, %c0_21] : memref<1x1xf32, #tpu.memory_space<smem>>
      memref.store %34, %arg8[%c0_20, %c0_21] : memref<1x1xf32, #tpu.memory_space<smem>>
    } else {
    }
    return
  }
  func.func @transform_0(%arg0: i32, %arg1: i32) -> (i32, i32) {
    %c1_i32 = arith.constant 1 : i32
    %0 = arith.muli %arg0, %c1_i32 : i32
    %1 = arith.addi %0, %arg1 : i32
    %c0_i32 = arith.constant 0 : i32
    %c0_i32_0 = arith.constant 0 : i32
    return %1, %c0_i32 : i32, i32
  }
  func.func @transform_1(%arg0: i32, %arg1: i32) -> (i32, i32) {
    %c1_i32 = arith.constant 1 : i32
    %0 = arith.muli %arg0, %c1_i32 : i32
    %1 = arith.addi %0, %arg1 : i32
    %c0_i32 = arith.constant 0 : i32
    %c0_i32_0 = arith.constant 0 : i32
    return %1, %c0_i32 : i32, i32
  }
  func.func @transform_2(%arg0: i32, %arg1: i32) -> (i32, i32) {
    %c1_i32 = arith.constant 1 : i32
    %0 = arith.muli %arg0, %c1_i32 : i32
    %1 = arith.addi %0, %arg1 : i32
    %c0_i32 = arith.constant 0 : i32
    %c0_i32_0 = arith.constant 0 : i32
    return %1, %c0_i32 : i32, i32
  }
  func.func @transform_3(%arg0: i32, %arg1: i32) -> (i32, i32) {
    %c0_i32 = arith.constant 0 : i32
    %c0_i32_0 = arith.constant 0 : i32
    %c0_i32_1 = arith.constant 0 : i32
    return %c0_i32, %c0_i32_0 : i32, i32
  }
  func.func @transform_4(%arg0: i32, %arg1: i32) -> (i32, i32) {
    %c0_i32 = arith.constant 0 : i32
    %c0_i32_0 = arith.constant 0 : i32
    %c0_i32_1 = arith.constant 0 : i32
    return %c0_i32, %c0_i32_0 : i32, i32
  }
  func.func @transform_5(%arg0: i32, %arg1: i32) -> (i32, i32) {
    %c0_i32 = arith.constant 0 : i32
    %c0_i32_0 = arith.constant 0 : i32
    %c0_i32_1 = arith.constant 0 : i32
    return %c0_i32, %c0_i32_0 : i32, i32
  }
  func.func @transform_6(%arg0: i32, %arg1: i32) -> (i32, i32) {
    %c0_i32 = arith.constant 0 : i32
    %c0_i32_0 = arith.constant 0 : i32
    return %arg0, %c0_i32 : i32, i32
  }
  func.func @transform_7(%arg0: i32, %arg1: i32) -> (i32, i32) {
    %c0_i32 = arith.constant 0 : i32
    %c0_i32_0 = arith.constant 0 : i32
    return %arg0, %c0_i32 : i32, i32
  }
  func.func @transform_8(%arg0: i32, %arg1: i32) -> (i32, i32) {
    %c0_i32 = arith.constant 0 : i32
    %c0_i32_0 = arith.constant 0 : i32
    return %arg0, %c0_i32 : i32, i32
  }
}

</mosaic_0001>

<bundles_post_ra>
// kernel: tpu_custom_call.1
= control target key start
LH: loop header
LB: loop body
LE: loop exit
PB: predicated region body
PF: predicated region fallthrough
CT: control target
= control target key end

     0   :  { %14 = vsyncpa [#allocation4], 0  ;;  %vm109_vm0 = vcmask 15360   ;;  %v453_v4 = vmov 0   ;;  %s649_s0 = inlined_call_operand.vmem [shape: f32[48,128], index: 0, kind: input, shape index: {}]   ;;  %s650_s1 = inlined_call_operand.vmem [shape: s32[48,1], index: 1, kind: input, shape index: {}]   ;;  %s651_s2 = inlined_call_operand.vmem [shape: f32[48,1], index: 2, kind: input, shape index: {}]   ;;  %s652_s3 = inlined_call_operand.vmem [shape: f32[16,2], index: 3, kind: input, shape index: {}]   ;;  %s653_s4 = inlined_call_operand.vmem [shape: s32[16,1], index: 4, kind: input, shape index: {}]   ;;  %s654_s5 = inlined_call_operand.vmem [shape: f32[1,3], index: 5, kind: input, shape index: {}]   ;;  %s655_s6 = inlined_call_operand.hbm [shape: f32[1,1], index: 6, kind: output, shape index: {0}]   ;;  %s656_s7 = inlined_call_operand.hbm [shape: f32[1,1], index: 7, kind: output, shape index: {1}]   ;;  %s657_s8 = inlined_call_operand.hbm [shape: f32[1,1], index: 8, kind: output, shape index: {2}]  }
   0x1   :  { %v506_v0 = vld [vmem:[%s652_s3] sm:$0xff]  ;;  %v511_v1 = vld [vmem:[%s652_s3 + $0x8] sm:$0xff]  ;;  %415 = vset.pattern.permute.xlu1 %v453_v4  ;;  %416 = vset.pattern.permute.xlu0 %v453_v4  ;;  %v536_v8 = vld [vmem:[%s651_s2 + $0x18] sm:$0xff] }
   0x2   :  { %v202_v2 = vld [vmem:[%s650_s1] sm:$0xff]  ;;  %v110_v3 = vsel %vm109_vm0, %v506_v0, -inf  ;;  %v203_v6 = vld [vmem:[%s650_s1 + $0x8] sm:$0xff]  ;;  %v113_v9 = vsel %vm109_vm0, %v511_v1, -inf  ;;  %vm217_vm3 = vcmp.eq.f32.partialorder %v536_v8, 0.0  ;;  %v205_v15 = vld [vmem:[%s650_s1 + $0x18] sm:$0xff] }
   0x3   :  { %v521_v5 = vld [vmem:[%s651_s2] sm:$0xff]  ;;  %v529_v7 = vld [vmem:[%s651_s2 + $0x8] sm:$0xff]  ;;  %111 = vmax.xlane.f32.xlu0 %v110_v3  ;;  %v223_v16 = vsel %vm217_vm3, 2, %v453_v4 }
   0x4   :  { %vm214_vm1 = vcmp.eq.f32.partialorder %v521_v5, 0.0  ;;  %vm215_vm2 = vcmp.eq.f32.partialorder %v529_v7, 0.0  ;;  %v544_v12 = vld [vmem:[%s651_s2 + $0x20] sm:$0xff] }
   0x5   :  { %v220_v10 = vsel %vm214_vm1, 2, %v453_v4  ;;  %v221_v11 = vsel %vm215_vm2, 2, %v453_v4 }
   0x6   :  { %v226_v13 = vadd.s32 %v220_v10, %v202_v2  ;;  %v227_v14 = vadd.s32 %v221_v11, %v203_v6 }
   0x7   :  { %15 = vsyncpa [#allocation6], 0  ;;  %114 = vmax.xlane.f32.xlu0 %v113_v9  ;;  %vm218_vm4 = vcmp.eq.f32.partialorder %v544_v12, 0.0  ;;  %v553_v18 = vld [vmem:[%s651_s2 + $0x28] sm:$0xff]  ;;  %v229_v20 = vadd.s32 %v223_v16, %v205_v15  ;;  %v206_v21 = vld [vmem:[%s650_s1 + $0x20] sm:$0xff]  ;;  %v134_v37 = vlaneseq  ;;  %vm98_vm9 = vcmask 7168  }
   0x8   :  { %v398_v17 = vadd.s32 4294967294, %v226_v13  ;;  %v399_v19 = vadd.s32 4294967294, %v227_v14  ;;  %v224_v22 = vsel %vm218_vm4, 2, %v453_v4  ;;  %vm219_vm5 = vcmp.eq.f32.partialorder %v553_v18, 0.0  ;;  %v562_v23 = vld [vmem:[%s651_s2 + $0x10] sm:$0xff]  ;;  %v207_v26 = vld [vmem:[%s650_s1 + $0x28] sm:$0xff] }
   0x9   :  { %v401_v24 = vadd.s32 4294967294, %v229_v20  ;;  %v230_v25 = vadd.s32 %v224_v22, %v206_v21  ;;  %v225_v27 = vsel %vm219_vm5, 2, %v453_v4  ;;  %vm216_vm6 = vcmp.eq.f32.partialorder %v562_v23, 0.0  ;;  %v204_v30 = vld [vmem:[%s650_s1 + $0x10] sm:$0xff]  ;;  %v107_v35 = vld [vmem:[%s653_s4] sm:$0xff]  ;;  %v108_v36 = vld [vmem:[%s653_s4 + $0x8] sm:$0xff] }
   0xa   :  { %241 = vperm.xlu1 %415, %v398_v17   ;;  %v231_v29 = vadd.s32 %v225_v27, %v207_v26  ;;  %v222_v31 = vsel %vm216_vm6, 2, %v453_v4  ;;  %v135_v38 = vand.u32 127, %v134_v37  ;;  %v196_v39 = vld [vmem:[%s649_s0] sm:$0xff]  ;;  %v197_v42 = vld [vmem:[%s649_s0 + $0x8] sm:$0xff]  ;;  %v454_v55 = vmov 0.0   ;;  %v198_v57 = vld [vmem:[%s649_s0 + $0x10] sm:$0xff] }
   0xb   :  { %v402_v28 = vadd.s32 4294967294, %v230_v25  ;;  %v228_v33 = vadd.s32 %v222_v31, %v204_v30  ;;  %v201_v53 = vld [vmem:[%s649_s0 + $0x28] sm:$0xff]  ;;  %100 = vst.msk [vmem:[#allocation2 + $0x8] sm:$0xff] %vm98_vm9, %v454_v55  ;;  %99 = vst.msk [vmem:[#allocation2] sm:$0xff] %vm98_vm9, %v454_v55  ;;  %v199_v9 = vld [vmem:[%s649_s0 + $0x18] sm:$0xff]  ;;  %vm178_vm1 = vcmask 16384  }
   0xc   :  { %v403_v32 = vadd.s32 4294967294, %v231_v29  ;;  %101 = vst.msk [vmem:[#allocation2 + $0x10] sm:$0xff] %vm98_vm9, %v454_v55  ;;  %102 = vst.msk [vmem:[#allocation2 + $0x18] sm:$0xff] %vm98_vm9, %v454_v55  ;;  %v177_v15 = vld [vmem:[%s654_s5] sm:$0x1]  ;;  %s455_s24 = smov [#allocation5]  }
   0xd   :  { %v400_v34 = vadd.s32 4294967294, %v228_v33  ;;  %103 = vst.msk [vmem:[#allocation2 + $0x20] sm:$0xff] %vm98_vm9, %v454_v55  ;;  %104 = vst.msk [vmem:[#allocation2 + $0x28] sm:$0xff] %vm98_vm9, %v454_v55  ;;  %v179_v16 = vsel %vm178_vm1, %v177_v15, 0.0  ;;  %s456_s28 = smov [#allocation3]   ;;  %s457_s9 = smov [#allocation7]  }
   0xe   :  { %244 = vperm.xlu1 %415, %v399_v19  }
  0x12   :  { %250 = vperm.xlu1 %415, %v401_v24   ;;  %v282_v20 = vld [vmem:[#allocation2] sm:$0xff]  ;;  %v283_v26 = vld [vmem:[#allocation2 + $0x8] sm:$0xff] }
  0x14   :  { %v287_v30 = vld [vmem:[#allocation2 + $0x28] sm:$0xff] }
  0x16   :  { %253 = vperm.xlu1 %415, %v402_v28  }
  0x1a   :  { %256 = vperm.xlu1 %415, %v403_v32  }
  0x1d   :  { %247 = vperm.xlu0 %416, %v400_v34  }
  0x1e   :  { %137 = vperm.xlu1 %415, %v107_v35  }
  0x22   :  { %140 = vperm.xlu1 %415, %v108_v36  }
  0x85   :  { %v242_v40 = vpop.permute.xlu1 %241 }
  0x86   :  { %vm258_vm7 = vcmp.eq.s32.totalorder %v135_v38, %v242_v40  ;;  %v285_v40 = vld [vmem:[#allocation2 + $0x18] sm:$0xff] }
  0x87   :  { %v264_v41 = vsel %vm258_vm7, %v196_v39, 0.0 }
  0x88   :  { %270 = vadd.xlane.f32.xlu1 %v264_v41 }
  0x89   :  { %v245_v43 = vpop.permute.xlu1 %244 }
  0x8a   :  { %vm259_vm8 = vcmp.eq.s32.totalorder %v135_v38, %v245_v43 }
  0x8b   :  { %v265_v44 = vsel %vm259_vm8, %v197_v42, 0.0 }
  0x8c   :  { %272 = vadd.xlane.f32.xlu0 %v265_v44  ;;  %v583_v46 = vpop.xlane.xlu0 %111 }
  0x8d   :  { %v251_v45 = vpop.permute.xlu1 %250  ;;  %v116_v47 = vsub.f32 %v506_v0, %v583_v46 }
  0x8e   :  { %vm261_vm13 = vcmp.eq.s32.totalorder %v135_v38, %v251_v45  ;;  %v286_v45 = vld [vmem:[#allocation2 + $0x20] sm:$0xff] }
  0x8f   :  { %v118_v48 = vmul.f32 1.442695, %v116_v47  ;;  %v267_v10 = vsel %vm261_vm13, %v199_v9, 0.0 }
  0x90   :  { %v587_v50 = vpop.xlane.xlu0 %114 }
  0x91   :  { %v254_v49 = vpop.permute.xlu1 %253  ;;  %417 = vpow2.f32 %v118_v48  ;;  %v117_v51 = vsub.f32 %v511_v1, %v587_v50 }
  0x92   :  { %vm262_vm14 = vcmp.eq.s32.totalorder %v135_v38, %v254_v49 }
  0x93   :  { %v120_v52 = vmul.f32 1.442695, %v117_v51 }
  0x95   :  { %v257_v54 = vpop.permute.xlu1 %256  ;;  %419 = vpow2.f32 %v120_v52 }
  0x96   :  { %vm263_vm10 = vcmp.eq.s32.totalorder %v135_v38, %v257_v54 }
  0x97   :  { %v269_v56 = vsel %vm263_vm10, %v201_v53, 0.0 }
  0x98   :  { %280 = vadd.xlane.f32.xlu0 %v269_v56  ;;  %v248_v59 = vpop.permute.xlu0 %247 }
  0x99   :  { %v138_v58 = vpop.permute.xlu1 %137  ;;  %vm260_vm11 = vcmp.eq.s32.totalorder %v135_v38, %v248_v59 }
  0x9a   :  { %v266_v60 = vsel %vm260_vm11, %v198_v57, 0.0  ;;  %vm142_vm15 = vcmp.eq.s32.totalorder %v135_v38, %v138_v58 }
  0x9b   :  { %274 = vadd.xlane.f32.xlu1 %v266_v60  ;;  %v144_v13 = vsel %vm142_vm15, %v506_v0, 0.0 }
  0x9c   :  { %v146_v14 = vsel %vm109_vm0, %v144_v13, 0.0 }
  0x9d   :  { %v141_v61 = vpop.permute.xlu1 %140 }
  0x9e   :  { %vm143_vm12 = vcmp.eq.s32.totalorder %v135_v38, %v141_v61  ;;  %v418_v62 = vpop.eup %417 }
  0x9f   :  { %v145_v63 = vsel %vm143_vm12, %v511_v1, 0.0  ;;  %v122_v3 = vsel %vm109_vm0, %v418_v62, 0.0  ;;  %v200_v1 = vld [vmem:[%s649_s0 + $0x20] sm:$0xff] }
  0xa0   :  { %v149_v2 = vsel %vm109_vm0, %v145_v63, 0.0  ;;  %123 = vadd.xlane.f32.xlu1 %v122_v3  ;;  %v268_v11 = vsel %vm262_vm14, %v200_v1, 0.0 }
  0xa1   :  { %150 = vadd.xlane.f32.xlu0 %v149_v2 }
  0xa2   :  { %v420_v4 = vpop.eup %419 }
  0xa3   :  { %v125_v6 = vsel %vm109_vm0, %v420_v4, 0.0 }
  0xa4   :  { %126 = vadd.xlane.f32.xlu1 %v125_v6 }
  0xa5   :  { %180 = vadd.xlane.f32.xlu0 %v179_v16 }
  0xa8   :  { %276 = vadd.xlane.f32.xlu1 %v267_v10 }
  0xac   :  { %278 = vadd.xlane.f32.xlu1 %v268_v11 }
  0xb0   :  { %147 = vadd.xlane.f32.xlu1 %v146_v14 }
 0x111   :  { %v271_v17 = vpop.xlane.xlu1 %270 }
 0x112   :  { %v288_v19 = vsub.f32 0.0, %v271_v17 }
 0x114   :  { %v294_v21 = vmul.f32 %v288_v19, %v521_v5  ;;  %v284_v5 = vld [vmem:[#allocation2 + $0x10] sm:$0xff] }
 0x115   :  { %v273_v22 = vpop.xlane.xlu0 %272 }
 0x116   :  { %v289_v24 = vsub.f32 0.0, %v273_v22  ;;  %v300_v25 = vadd.f32 %v294_v21, %v282_v20 }
 0x118   :  { %v295_v0 = vmul.f32 %v289_v24, %v529_v7  ;;  %307 = vst.msk [vmem:[#allocation2] sm:$0xff] %vm98_vm9, %v300_v25 }
 0x11a   :  { %v301_v27 = vadd.f32 %v295_v0, %v283_v26 }
 0x11c   :  { %308 = vst.msk [vmem:[#allocation2 + $0x8] sm:$0xff] %vm98_vm9, %v301_v27 }
 0x11f   :  { %v316_v47 = vld [vmem:[#allocation2] sm:$0xff] }
 0x120   :  { %v322_v53 = vsel %vm98_vm9, %v316_v47, 0.0 }
 0x121   :  { %v281_v28 = vpop.xlane.xlu0 %280 }
 0x122   :  { %v293_v29 = vsub.f32 0.0, %v281_v28 }
 0x123   :  { %v317_v48 = vld [vmem:[#allocation2 + $0x8] sm:$0xff] }
 0x124   :  { %v299_v31 = vmul.f32 %v293_v29, %v553_v18  ;;  %v275_v32 = vpop.xlane.xlu1 %274  ;;  %v323_v54 = vsel %vm98_vm9, %v317_v48, 0.0 }
 0x125   :  { %v290_v34 = vsub.f32 0.0, %v275_v32  ;;  %v324_v58 = vadd.f32 %v323_v54, %v322_v53 }
 0x126   :  { %v305_v33 = vadd.f32 %v299_v31, %v287_v30 }
 0x127   :  { %v296_v35 = vmul.f32 %v290_v34, %v562_v23 }
 0x128   :  { %312 = vst.msk [vmem:[#allocation2 + $0x28] sm:$0xff] %vm98_vm9, %v305_v33 }
 0x129   :  { %v302_v36 = vadd.f32 %v296_v35, %v284_v5  ;;  %v124_v7 = vpop.xlane.xlu1 %123 }
 0x12a   :  { %421 = vlog2.f32 %v124_v7 }
 0x12b   :  { %309 = vst.msk [vmem:[#allocation2 + $0x10] sm:$0xff] %vm98_vm9, %v302_v36 }
 0x12d   :  { %v127_v37 = vpop.xlane.xlu1 %126 }
 0x12e   :  { %423 = vlog2.f32 %v127_v37 }
 0x12f   :  { %v321_v10 = vld [vmem:[#allocation2 + $0x28] sm:$0xff] }
 0x130   :  { %v331_v13 = vsel %vm98_vm9, %v321_v10, 0.0 }
 0x131   :  { %v277_v38 = vpop.xlane.xlu1 %276 }
 0x132   :  { %v291_v39 = vsub.f32 0.0, %v277_v38  ;;  %v318_v55 = vld [vmem:[#allocation2 + $0x10] sm:$0xff] }
 0x133   :  { %v325_v61 = vsel %vm98_vm9, %v318_v55, 0.0 }
 0x134   :  { %v297_v18 = vmul.f32 %v291_v39, %v536_v8  ;;  %v326_v2 = vadd.f32 %v325_v61, %v324_v58 }
 0x135   :  { %v279_v41 = vpop.xlane.xlu1 %278 }
 0x136   :  { %v303_v42 = vadd.f32 %v297_v18, %v285_v40  ;;  %v292_v43 = vsub.f32 0.0, %v279_v41 }
 0x137   :  { %v422_v44 = vpop.eup %421 }
 0x138   :  { %v129_v23 = vmul.f32 0.6931472, %v422_v44  ;;  %310 = vst.msk [vmem:[#allocation2 + $0x18] sm:$0xff] %vm98_vm9, %v303_v42  ;;  %v298_v49 = vmul.f32 %v292_v43, %v544_v12  ;;  %v151_v12 = vpop.xlane.xlu0 %150 }
 0x139   :  { %v148_v57 = vpop.xlane.xlu1 %147 }
 0x13a   :  { %v304_v51 = vadd.f32 %v298_v49, %v286_v45  ;;  %v132_v52 = vadd.f32 %v129_v23, %v583_v46 }
 0x13b   :  { %v424_v8 = vpop.eup %423 }
 0x13c   :  { %v131_v56 = vmul.f32 0.6931472, %v424_v8  ;;  %311 = vst.msk [vmem:[#allocation2 + $0x20] sm:$0xff] %vm98_vm9, %v304_v51  ;;  %v161_v60 = vsub.f32 %v132_v52, %v148_v57  ;;  %v181_v15 = vpop.xlane.xlu0 %180 }
 0x13d   :  { %v182_v16 = vrot.slane %v181_v15, 4 }
 0x13e   :  { %v133_v59 = vadd.f32 %v131_v56, %v587_v50  ;;  %v165_v3 = vsel %vm98_vm9, %v161_v60, 0.0 }
 0x13f   :  { %v319_v62 = vld [vmem:[#allocation2 + $0x18] sm:$0xff]  ;;  %v183_v17 = vadd.f32 %v182_v16, %v181_v15 }
 0x140   :  { %v162_v63 = vsub.f32 %v133_v59, %v151_v12  ;;  %v327_v46 = vsel %vm98_vm9, %v319_v62, 0.0 }
 0x141   :  { %v328_v1 = vadd.f32 %v327_v46, %v326_v2  ;;  %v184_v19 = vrot.slane %v183_v17, 2 }
 0x142   :  { %v166_v4 = vsel %vm98_vm9, %v162_v63, 0.0 }
 0x143   :  { %v167_v6 = vadd.f32 %v166_v4, %v165_v3  ;;  %v320_v9 = vld [vmem:[#allocation2 + $0x20] sm:$0xff]  ;;  %v185_v24 = vadd.f32 %v184_v19, %v183_v17 }
 0x144   :  { %v329_v11 = vsel %vm98_vm9, %v320_v9, 0.0 }
 0x145   :  { %168 = vadd.xlane.f32.xlu1 %v167_v6  ;;  %v330_v50 = vadd.f32 %v329_v11, %v328_v1  ;;  %v186_v29 = vrot.slane %v185_v24, 1 }
 0x147   :  { %v332_v14 = vadd.f32 %v331_v13, %v330_v50  ;;  %v187_v34 = vadd.f32 %v186_v29, %v185_v24 }
 0x149   :  { %333 = vadd.xlane.f32.xlu1 %v332_v14 }
 0x1ce   :  { %v169_v20 = vpop.xlane.xlu1 %168 }
 0x1cf   :  { %v170_v21 = vrot.slane %v169_v20, 4 }
 0x1d1   :  { %v171_v22 = vadd.f32 %v170_v21, %v169_v20 }
 0x1d2   :  { %v334_v25 = vpop.xlane.xlu1 %333 }
 0x1d3   :  { %v172_v26 = vrot.slane %v171_v22, 2  ;;  %v335_v0 = vrot.slane %v334_v25, 4 }
 0x1d5   :  { %v336_v27 = vadd.f32 %v335_v0, %v334_v25  ;;  %v173_v28 = vadd.f32 %v172_v26, %v171_v22 }
 0x1d7   :  { %v337_v30 = vrot.slane %v336_v27, 2  ;;  %v174_v31 = vrot.slane %v173_v28, 1 }
 0x1d9   :  { %v338_v32 = vadd.f32 %v337_v30, %v336_v27  ;;  %v175_v33 = vadd.f32 %v174_v31, %v173_v28 }
 0x1db   :  { %404 = vpush %v175_v33  ;;  %v339_v5 = vrot.slane %v338_v32, 1 }
 0x1dc   :  { %406 = vpush %v187_v34 }
 0x1dd   :  { %v340_v35 = vadd.f32 %v339_v5, %v338_v32 }
 0x1df   :  { %408 = vpush %v340_v35 }
 0x20c   :  { %s405_s0 = spop %404 }
 0x20d   :  { %192 = sst [smem:[#allocation5]] %s405_s0  ;;  %s407_s5 = spop %406 }
 0x20e   :  { %195 = sst [smem:[#allocation7]] %s407_s5 }
 0x20f   :  { %359 = dma.smem_to_hbm %s455_s24, 16, %s656_s7, [#allocation6]  }
 0x210   :  { %s409_s27 = spop %408 }
 0x211   :  { %343 = sst [smem:[#allocation3]] %s409_s27 }
 0x212   :  { %351 = dma.smem_to_hbm %s456_s28, 16, %s655_s6, [#allocation4]  }
 0x213   :  { %367 = dma.smem_to_hbm %s457_s9, 16, %s657_s8, [#allocation6]  }
 0x214   :  { %449 = dma.done.wait [#allocation4], 16  }
 0x215   :  { %450 = vsyncadd [#allocation4], 4294967280 }
 0x216   :  { %451 = dma.done.wait [#allocation6], 32  }
 0x217   :  { %452 = vsyncadd [#allocation6], 4294967264 }
 0x218   :  { %377 = sfence }
 0x219   :  { %378 = vsyncpa [#allocation4], 1 }
 0x21a   :  { %379 = vsyncpa [#allocation6], 1 }

</bundles_post_ra>
